<compile_context>
chip_gen: v7x
topology: tpu7x:2x2x1
jax: 0.10.0
libtpu: 0.0.40
codegen_flags: <defaults>
</compile_context>

<pallas_src>
import functools
import math

import jax
import jax.numpy as jnp
from jax import lax
from jax.experimental import pallas as pl
from jax.experimental.pallas import tpu as pltpu


def _round_up(x, m):
    return ((x + m - 1) // m) * m


def _round_down(x, m):
    return (x // m) * m


def _detect_vmem_capacity_bytes():
    """Best-effort VMEM capacity query; conservative (v7x = 64 MiB) fallback."""
    try:
        info = pltpu.get_tpu_info()
        cap = int(getattr(info, "vmem_capacity_bytes", 0))
        if cap > 0:
            return cap
    except Exception:
        pass
    return 64 * 1024 * 1024


_VMEM_CAP_BYTES = _detect_vmem_capacity_bytes()


def _pick_fold(batch, n):
    """Largest divisor f of n with batch*f <= 256, preferring n//f >= 128.

    Folding part of the reduced axis into the row (sublane) dimension is a
    zero-copy reshape that fills sublanes for small batches; it is undone by a
    tiny (batch, fold) sum in the wrapper.
    """
    if batch >= 128 or n <= 1:
        return 1
    limit = max(1, 256 // batch)
    divisors = [f for f in range(1, min(limit, n) + 1) if n % f == 0]
    lane_friendly = [f for f in divisors if n // f >= 128]
    return max(lane_friendly) if lane_friendly else max(divisors)


def _kl_kernel(p_ref, q_ref, o_ref, acc_ref, *, ncols, chunk, need_mask):
    k = pl.program_id(1)          # position along the reduced (N) axis
    nk = pl.num_programs(1)

    @pl.when(k == 0)
    def _init():
        acc_ref[...] = jnp.zeros_like(acc_ref)

    n_strips = chunk // 128       # chunk is always a multiple of 128
    unroll = max(1, min(4, n_strips))

    def accumulate(masked):
        # Strip-wise: load 128 lanes at a time straight from the input refs,
        # compute the loss term, and add into a register-carried f32 acc.
        def body(j, acc):
            start = pl.multiple_of(j * 128, 128)
            p = p_ref[:, pl.ds(start, 128)].astype(jnp.float32)
            q = q_ref[:, pl.ds(start, 128)].astype(jnp.float32)
            t = jnp.where(p > 0.0, -p * jnp.log(q), p)
            if masked:
                # Drop lanes past the real end of the row (edge-block garbage
                # may be NaN/Inf; jnp.where is a true select so it never
                # contaminates kept lanes).
                col = (k * chunk + start
                       + lax.broadcasted_iota(jnp.int32, t.shape, 1))
                t = jnp.where(col < ncols, t, 0.0)
            return acc + t

        acc_ref[...] = lax.fori_loop(0, n_strips, body, acc_ref[...],
                                     unroll=unroll)

    if need_mask:
        # Only the last chunk can overhang ncols -> mask only there; the
        # steady-state chunks run the cheaper unmasked loop.
        @pl.when(k < nk - 1)
        def _steady():
            accumulate(False)

        @pl.when(k == nk - 1)
        def _last():
            accumulate(True)
    else:
        accumulate(False)

    @pl.when(k == nk - 1)
    def _finalize():
        o_ref[...] = jnp.sum(acc_ref[...], axis=-1,
                             keepdims=True).astype(o_ref.dtype)


@functools.partial(jax.jit, static_argnames=("block_bytes",))
def kl_div_loss(p, q, block_bytes=None):
    """forward(p, q) of the PyTorch KLDivLoss module, on TPU via Pallas."""
    assert p.shape == q.shape, (p.shape, q.shape)
    B = p.shape[0]
    N = int(math.prod(p.shape[1:])) if p.ndim > 1 else 1
    out_dtype = p.dtype

    # ---- fold part of N into the row (sublane) dim (zero-copy reshape) ----
    fold = _pick_fold(B, N)
    rows = B * fold
    ncols = N // fold
    p2 = p.reshape(rows, ncols)
    q2 = q.reshape(rows, ncols)

    itemsize = jnp.dtype(p2.dtype).itemsize
    big_vmem = _VMEM_CAP_BYTES >= (100 << 20)          # v5e/v6e: 128 MiB
    if block_bytes is None:
        target_block_bytes = (8 << 20) if big_vmem else (4 << 20)
    else:
        target_block_bytes = int(block_bytes)

    # ---- row (sublane) tiling: >= 2 blocks along the parallel axis when
    # possible so v7x's two TensorCores both get work. -----------------------
    max_tb = 128
    if rows <= 8:
        tb = rows                              # equals full dim -> legal
    elif rows <= 2 * max_tb:
        tb = min(max_tb, _round_up(-(-rows // 2), 8))   # -> nb == 2
    else:
        tb = max_tb
    nb = -(-rows // tb)

    # ---- column (lane) tiling: chunk is always a multiple of 128; any
    # overhang past ncols lives in the last chunk and is masked in-kernel. ---
    chunk_cols = _round_down(max(target_block_bytes // (itemsize * tb), 128),
                             128)
    if ncols <= chunk_cols:
        chunk = _round_up(ncols, 128)
        nk = 1
    else:
        chunk = chunk_cols
        nk = -(-ncols // chunk)
    need_mask = (nk * chunk != ncols)

    block_b = tb * chunk * itemsize
    vmem_bytes = (2 * 2 * block_b                      # 2 inputs, double-buffered
                  + tb * 128 * 4                       # f32 accumulator scratch
                  + 4 * tb * jnp.dtype(out_dtype).itemsize   # output blocks
                  + (4 << 20))                         # strip temps + headroom
    hard_cap = (96 << 20) if big_vmem else (48 << 20)
    vmem_limit = int(min(max(vmem_bytes, 16 << 20), hard_cap))

    kernel = functools.partial(_kl_kernel, ncols=ncols, chunk=chunk,
                               need_mask=need_mask)

    out = pl.pallas_call(
        kernel,
        out_shape=jax.ShapeDtypeStruct((rows, 1), out_dtype),
        grid_spec=pltpu.PrefetchScalarGridSpec(
            num_scalar_prefetch=0,
            grid=(nb, nk),                             # reduction axis last
            in_specs=[
                pl.BlockSpec((tb, chunk), lambda b, k: (b, k)),
                pl.BlockSpec((tb, chunk), lambda b, k: (b, k)),
            ],
            out_specs=pl.BlockSpec((tb, 1), lambda b, k: (b, 0)),
            scratch_shapes=[pltpu.VMEM((tb, 128), jnp.float32)],
        ),
        compiler_params=pltpu.CompilerParams(
            dimension_semantics=("parallel", "arbitrary"),
            vmem_limit_bytes=vmem_limit,
        ),
    )(p2, q2)

    # Undo the sublane fold: each original batch row was split into `fold`
    # consecutive sub-rows; sum their partial results (tiny wrapper reduce).
    return out.reshape(B, fold).sum(axis=-1)


def _reference(p, q):
    B = p.shape[0]
    p2 = p.reshape(B, -1).astype(jnp.float32)
    q2 = q.reshape(B, -1).astype(jnp.float32)
    terms = jnp.where(p2 > 0.0, -p2 * jnp.log(q2), p2)
    return jnp.sum(terms, axis=-1).astype(p.dtype)


if __name__ == "__main__":
    key = jax.random.PRNGKey(0)
    kp, kq, kp2, kq2 = jax.random.split(key, 4)

    # --- case 1: the module's nominal NCHW shape ----------------------------
    B, C, H, W = 2, 4, 16, 16
    logits_p = jax.random.normal(kp, (B, C, H, W), dtype=jnp.float32)
    p = jax.nn.softmax(logits_p.reshape(B, -1), axis=-1).reshape(B, C, H, W)
    p = jnp.where(p > (1.0 / (C * H * W)), p, 0.0)   # exercise the p<=0 branch
    logits_q = jax.random.normal(kq, (B, C, H, W), dtype=jnp.float32)
    q = jax.nn.softmax(logits_q.reshape(B, -1), axis=-1).reshape(B, C, H, W)

    out = kl_div_loss(p, q)
    jax.block_until_ready(out)
    ref = _reference(p, q)
    assert out.shape == (B,)
    assert jnp.allclose(out, ref, rtol=1e-5, atol=1e-4), (out, ref)

    # --- case 2: ragged rows + ragged lane padding (single chunk, masked) ---
    # N = 3*500*350 = 525000 -> fold=125 -> rows=250 (rows % tb != 0: exercises
    # OOB-row edge blocks) and ncols=4200 (chunk padded to 4224 + iota mask).
    shape2 = (2, 3, 500, 350)
    p_b = jax.random.uniform(kp2, shape2, dtype=jnp.float32)
    p_b = jnp.where(p_b > 0.3, p_b, 0.0)
    q_b = jax.random.uniform(kq2, shape2, dtype=jnp.float32,
                             minval=0.05, maxval=1.0)
    out2 = kl_div_loss(p_b, q_b)
    jax.block_until_ready(out2)
    ref2 = _reference(p_b, q_b)
    assert out2.shape == (2,)
    assert jnp.allclose(out2, ref2, rtol=1e-4, atol=1e-3), (out2, ref2)

    # --- case 3: force tiny blocks -> multi-chunk grid (steady unmasked
    # chunks + masked last chunk + cross-step accumulation), same data. ------
    out3 = kl_div_loss(p_b, q_b, block_bytes=64 * 1024)
    jax.block_until_ready(out3)
    assert jnp.allclose(out3, ref2, rtol=1e-4, atol=1e-3), (out3, ref2)

    print("KERNEL_OK")
</pallas_src>

<mosaic_0001>
module attributes {stable_mosaic.version = 11 : i64} {
  func.func @_kl_kernel(%arg0: i32, %arg1: i32, %arg2: memref<8x128xf32, #tpu.memory_space<vmem>>, %arg3: memref<8x128xf32, #tpu.memory_space<vmem>>, %arg4: memref<8x1xf32, #tpu.memory_space<vmem>>, %arg5: memref<8x128xf32, #tpu.memory_space<vmem>>) attributes {dimension_semantics = [#tpu.dimension_semantics<parallel>, #tpu.dimension_semantics<arbitrary>], iteration_bounds = array<i64: 2, 1>, scalar_prefetch = 0 : i64, scratch_operands = 1 : i64, tpu.core_type = #tpu.core_type<tc>, window_params = [{transform_indices = @transform_0, window_bounds = array<i64: 8, 128>}, {transform_indices = @transform_1, window_bounds = array<i64: 8, 128>}, {transform_indices = @transform_2, window_bounds = array<i64: 8, 1>}]} {
    %c0_i32 = arith.constant 0 : i32
    %0 = arith.cmpi eq, %arg1, %c0_i32 : i32
    %1 = arith.extui %0 : i1 to i32
    %c0_i32_0 = arith.constant 0 : i32
    %2 = arith.cmpi ne, %1, %c0_i32_0 : i32
    scf.if %2 {
      %cst_10 = arith.constant 0.000000e+00 : f32
      %22 = vector.broadcast %cst_10 : f32 to vector<8x128xf32>
      %c0_11 = arith.constant 0 : index
      %c0_12 = arith.constant 0 : index
      %23 = vector.load %arg5[%c0_11, %c0_12] : memref<8x128xf32, #tpu.memory_space<vmem>>, vector<8x128xf32>
      tpu.vector_store %arg5[%c0_11, %c0_12], %22 {strides = array<i32>} : memref<8x128xf32, #tpu.memory_space<vmem>>, vector<8x128xf32>,
    } else {
    }
    %c0 = arith.constant 0 : index
    %c0_1 = arith.constant 0 : index
    %3 = vector.load %arg5[%c0, %c0_1] : memref<8x128xf32, #tpu.memory_space<vmem>>, vector<8x128xf32>
    %c0_i32_2 = arith.constant 0 : i32
    %c128_i32 = arith.constant 128 : i32
    %4 = arith.muli %c0_i32_2, %c128_i32 : i32
    %5 = tpu.assume_multiple %4, 128 : i32
    %c0_3 = arith.constant 0 : index
    %6 = arith.index_cast %5 : i32 to index
    %7 = vector.load %arg2[%c0_3, %6] : memref<8x128xf32, #tpu.memory_space<vmem>>, vector<8x128xf32>
    %c0_4 = arith.constant 0 : index
    %8 = arith.index_cast %5 : i32 to index
    %9 = vector.load %arg3[%c0_4, %8] : memref<8x128xf32, #tpu.memory_space<vmem>>, vector<8x128xf32>
    %cst = arith.constant 0.000000e+00 : f32
    %10 = vector.broadcast %cst : f32 to vector<8x128xf32>
    %11 = arith.cmpf ogt, %7, %10 : vector<8x128xf32>
    %cst_5 = arith.constant 0.000000e+00 : f32
    %12 = vector.broadcast %cst_5 : f32 to vector<8x128xf32>
    %13 = arith.subf %12, %7 : vector<8x128xf32>
    %14 = math.log %9 : vector<8x128xf32>
    %15 = arith.mulf %13, %14 : vector<8x128xf32>
    %16 = arith.select %11, %15, %7 : vector<8x128xi1>, vector<8x128xf32>
    %17 = arith.addf %3, %16 : vector<8x128xf32>
    %c1_i32 = arith.constant 1 : i32
    %c0_6 = arith.constant 0 : index
    %c0_7 = arith.constant 0 : index
    %18 = vector.load %arg5[%c0_6, %c0_7] : memref<8x128xf32, #tpu.memory_space<vmem>>, vector<8x128xf32>
    tpu.vector_store %arg5[%c0_6, %c0_7], %17 {strides = array<i32>} : memref<8x128xf32, #tpu.memory_space<vmem>>, vector<8x128xf32>,
    %c0_i32_8 = arith.constant 0 : i32
    %19 = arith.cmpi eq, %arg1, %c0_i32_8 : i32
    %20 = arith.extui %19 : i1 to i32
    %c0_i32_9 = arith.constant 0 : i32
    %21 = arith.cmpi ne, %20, %c0_i32_9 : i32
    scf.if %21 {
      %c0_10 = arith.constant 0 : index
      %c0_11 = arith.constant 0 : index
      %22 = vector.load %arg5[%c0_10, %c0_11] : memref<8x128xf32, #tpu.memory_space<vmem>>, vector<8x128xf32>
      %cst_12 = arith.constant dense<0.000000e+00> : vector<8xf32>
      %23 = vector.multi_reduction <add>, %22, %cst_12 [1] : vector<8x128xf32> to vector<8xf32>
      %24 = vector.shape_cast %23 : vector<8xf32> to vector<8x1xf32>
      %c0_13 = arith.constant 0 : index
      %c0_14 = arith.constant 0 : index
      %25 = vector.load %arg4[%c0_13, %c0_14] : memref<8x1xf32, #tpu.memory_space<vmem>>, vector<8x1xf32>
      tpu.vector_store %arg4[%c0_13, %c0_14], %24 {strides = array<i32>} : memref<8x1xf32, #tpu.memory_space<vmem>>, vector<8x1xf32>,
    } else {
    }
    return
  }
  func.func @transform_0(%arg0: i32, %arg1: i32) -> (i32, i32) {
    %c0_i32 = arith.constant 0 : i32
    return %arg0, %arg1 : i32, i32
  }
  func.func @transform_1(%arg0: i32, %arg1: i32) -> (i32, i32) {
    %c0_i32 = arith.constant 0 : i32
    return %arg0, %arg1 : i32, i32
  }
  func.func @transform_2(%arg0: i32, %arg1: i32) -> (i32, i32) {
    %c0_i32 = arith.constant 0 : i32
    %c0_i32_0 = arith.constant 0 : i32
    return %arg0, %c0_i32 : i32, i32
  }
}

</mosaic_0001>

<bundles_post_ra>
// kernel: kl_div_loss.1
= control target key start
LH: loop header
LB: loop body
LE: loop exit
PB: predicated region body
PF: predicated region fallthrough
CT: control target
= control target key end

     0   :  { %s368_s9 = smov 0   ;;  %s370_s10 = smov 0   ;;  %s401_s0 = inlined_call_operand.vmem [shape: f32[16,128], index: 0, kind: input, shape index: {}]   ;;  %s402_s1 = inlined_call_operand.vmem [shape: f32[16,128], index: 1, kind: input, shape index: {}]   ;;  %s403_s2 = inlined_call_operand.vmem [shape: f32[16,1], index: 2, kind: output, shape index: {}]  }
   0x1   :  { %s372_s11 = smov 0  }
   0x2 LB: > { %s24_s12 = sadd.s32 1, %s347_s10  ;;  %p297_p0 = scmp.ge.s32.totalorder %s351_s11, 1  ;;  %s351_s11 = sphi %s372_s11, %s12_s11   ;;  %s347_s10 = sphi %s370_s10, %s405_s10   ;;  %s343_s9 = sphi %s368_s9, %s404_s9  }
   0x3   : > { %p26_p1 = scmp.ge.s32.totalorder %s24_s12, 2  ;;  %p142_p2 = scmp.lt.s32.totalorder %s351_s11, 3 }
   0x5   : > { %s407_s12 = smov (%p26_p1, %s24_s12), 0  ;;  %p143_p3 = pnand %p297_p0, %p142_p2 }
   0x6   : > { %p172_p4 = scmp.lt.s32.totalorder (!%p143_p3), %s343_s9, 1  ;;  %vm212_vm1 = vcmask (!%p143_p3), 7168  }
   0x7   : > { %146 = sbr.rel (%p143_p3) target bundleno = 177 (0xb1), region = 28 }
   0xe   : > { %s409_s9 = smov (!%p172_p4, %s343_s9), 1 }
   0xf   : > { %s298_s13 = sshll.u32 %s409_s9, 3 }
  0x10   : > { %s185_s16 = scalar_lea.vmem %s402_s1, %s298_s13  ;;  %s178_s19 = scalar_lea.vmem %s401_s0, %s298_s13 }
  0x11   : > { %v197_v0 = vld [vmem:[%s185_s16] sm:$0xff]  ;;  %s189_s22 = scalar_lea.vmem %s403_s2, %s298_s13 }
  0x12   : > { %327 = vlog2.f32 %v197_v0  ;;  %v196_v1 = vld [vmem:[%s178_s19] sm:$0xff] }
  0x13   : > { %v199_v2 = vsub.f32 0.0, %v196_v1  ;;  %vm198_vm0 = vcmp.gt.f32.partialorder %v196_v1, 0.0 }
  0x1c   : > { %v328_v3 = vpop.eup %327 }
  0x1d   : > { %v201_v4 = vmul.f32 0.6931472, %v328_v3 }
  0x1f   : > { %v202_v5 = vmul.f32 %v201_v4, %v199_v2 }
  0x21   : > { %v203_v6 = vsel %vm198_vm0, %v202_v5, %v196_v1 }
  0x22   : > { %210 = vadd.xlane.f32.xlu0 %v203_v6 }
  0xaf   : > { %v211_v7 = vpop.xlane.xlu0 %210 }
  0xb0   : > { %213 = vst.msk [vmem:[%s189_s22] sm:$0xff] %vm212_vm1, %v211_v7 }
  0xb1 PF: > { %s12_s11 = sadd.s32 1, %s351_s11   ;;  %s404_s9 = smov %s347_s10 }
  0xb2   : > { %p9_p5 = scmp.ge.s32.totalorder %s12_s11, 4   ;;  %s405_s10 = smov %s407_s12 }
  0xb4   :  { %11 = sbr.rel (!%p9_p5) target bundleno = 2 (0x2), region = 69 }

</bundles_post_ra>
